<compile_context>
chip_gen: v5e
topology: v5e:2x2
jax: 0.10.0
libtpu: 0.0.40
codegen_flags: <defaults>
</compile_context>

<pallas_src>
import functools
import math

import jax
import jax.numpy as jnp
from jax.experimental import pallas as pl
from jax.experimental.pallas import tpu as pltpu


def _gaussian_noise_kernel(seed_ref, x_ref, o_ref, *, std, use_hw_prng):
    rows, lanes = x_ref.shape          # static block shape
    half = rows // 2                   # rows is always a multiple of 8 -> even
    pid = pl.program_id(0)

    if use_hw_prng:
        # Hardware PRNG; decorrelate every grid block (and every TC on v7x)
        # by mixing the program id into the seed.
        pltpu.prng_seed(seed_ref[0], pid)
        bits1 = pltpu.bitcast(pltpu.prng_random_bits((half, lanes)), jnp.uint32)
        bits2 = pltpu.bitcast(pltpu.prng_random_bits((half, lanes)), jnp.uint32)
        bitcast_f32 = lambda v: pltpu.bitcast(v, jnp.float32)
    else:
        # Portable counter-based hash PRNG (CPU / interpret fallback only).
        seed_u = seed_ref[0].astype(jnp.uint32)
        pid_u = pid.astype(jnp.uint32)
        row = jax.lax.broadcasted_iota(jnp.uint32, (half, lanes), 0)
        col = jax.lax.broadcasted_iota(jnp.uint32, (half, lanes), 1)
        # Global flat element index of the first / second half of this block.
        g1 = (pid_u * jnp.uint32(rows) + row) * jnp.uint32(lanes) + col
        g2 = g1 + jnp.uint32(half * lanes)
        key = seed_u * jnp.uint32(0x9E3779B1) + jnp.uint32(0x85EBCA77)

        def _mix(v):  # lowbias32-style integer finalizer
            v = (v ^ (v >> 16)) * jnp.uint32(0x7FEB352D)
            v = (v ^ (v >> 15)) * jnp.uint32(0x846CA68B)
            return v ^ (v >> 16)

        bits1 = _mix(g1 ^ key)
        bits2 = _mix(g2 ^ key)
        bitcast_f32 = lambda v: jax.lax.bitcast_convert_type(v, jnp.float32)

    # uint32 bits -> float32 in [1, 2) via the mantissa trick (no convert, no clamp).
    f1 = bitcast_f32((bits1 >> 9) | jnp.uint32(0x3F800000))
    f2 = bitcast_f32((bits2 >> 9) | jnp.uint32(0x3F800000))

    # Box-Muller using BOTH outputs: one 32-bit draw per output element.
    u1 = jnp.float32(2.0) - f1                       # (0, 1] -> log() always finite
    r = jnp.sqrt(jnp.float32(-2.0) * jnp.log(u1))
    theta = jnp.float32(2.0 * math.pi) * (f2 - jnp.float32(1.0))
    z1 = r * jnp.cos(theta)
    z2 = r * jnp.sin(theta)

    std_f = jnp.float32(std)
    o_ref[:half, :] = x_ref[:half, :] + (z1 * std_f).astype(o_ref.dtype)
    o_ref[half:, :] = x_ref[half:, :] + (z2 * std_f).astype(o_ref.dtype)


def gaussian_noise(x, seed: int = 0, std: float = 0.05):
    """Pallas version of GaussianNoise.forward: x + N(0, std^2) noise."""
    # TODO(synk): std is baked in as a compile-time constant (one compile per std
    # value), matching the fixed module hyperparameter.
    orig_shape = x.shape
    total = int(x.size)
    use_hw_prng = jax.default_backend() == "tpu"

    # ---- lane-dense 2D slab (rows, lanes); pad to a full (8, lanes) vreg ----
    lanes = 512 if total % (512 * 8) == 0 else 128
    chunk = lanes * 8
    padded = ((total + chunk - 1) // chunk) * chunk

    x_flat = x.reshape(-1)
    if padded != total:
        x_flat = jnp.pad(x_flat, (0, padded - total))
    rows = padded // lanes                         # multiple of 8

    # ---- ~2 MiB blocks: in+out double-buffered stays well under the 32 MiB
    # scoped-VMEM budget that is safe on v5e / v6e / v7x alike. ----
    tile_bytes = 2 * 1024 * 1024
    max_rows = max(8, (tile_bytes // (lanes * x_flat.dtype.itemsize)) // 8 * 8)
    block_rows = min(rows, max_rows)               # multiple of 8 -> even
    grid = (pl.cdiv(rows, block_rows),)

    x2d = x_flat.reshape(rows, lanes)
    seed_arr = jnp.asarray([seed], dtype=jnp.int32)

    kernel = functools.partial(
        _gaussian_noise_kernel, std=float(std), use_hw_prng=use_hw_prng)

    extra = {}
    if use_hw_prng:
        extra["compiler_params"] = pltpu.CompilerParams(
            dimension_semantics=("parallel",),     # shard across TCs on v7x
            vmem_limit_bytes=32 * 1024 * 1024,
        )
        extra["cost_estimate"] = pl.CostEstimate(
            flops=8 * padded,
            transcendentals=2 * padded,
            bytes_accessed=2 * padded * x_flat.dtype.itemsize,
        )

    out2d = pl.pallas_call(
        kernel,
        out_shape=jax.ShapeDtypeStruct((rows, lanes), x2d.dtype),
        grid=grid,
        in_specs=[
            pl.BlockSpec(memory_space=pltpu.MemorySpace.SMEM),    # seed scalar
            pl.BlockSpec((block_rows, lanes), lambda i: (i, 0)),  # x tile
        ],
        out_specs=pl.BlockSpec((block_rows, lanes), lambda i: (i, 0)),
        **extra,
    )(seed_arr, x2d)

    out_flat = out2d.reshape(-1)
    if padded != total:
        out_flat = out_flat[:total]
    return out_flat.reshape(orig_shape)


if __name__ == "__main__":
    key = jax.random.PRNGKey(0)
    # NCHW like the PyTorch module: batch=2, channels=4, 16x16 spatial.
    x = jax.random.normal(key, (2, 4, 16, 16), dtype=jnp.float32)

    std = 0.05
    y = gaussian_noise(x, seed=0, std=std)
    y = jax.block_until_ready(y)

    # Sanity checks: shape/dtype preserved, output = x + small finite noise.
    assert y.shape == x.shape and y.dtype == x.dtype
    noise = y - x
    assert bool(jnp.all(jnp.isfinite(noise)))
    # Box-Muller with 23-bit uniforms bounds |z| <= ~5.7, so |noise| <= ~0.29.
    assert float(jnp.max(jnp.abs(noise))) < 0.5
    assert float(jnp.std(noise)) > 0.0

    print("KERNEL_OK")
</pallas_src>

<mosaic_0001>
module attributes {stable_mosaic.version = 11 : i64} {
  func.func @_gaussian_noise_kernel(%arg0: i32, %arg1: memref<1xi32, #tpu.memory_space<smem>>, %arg2: memref<16x128xf32, #tpu.memory_space<vmem>>, %arg3: memref<16x128xf32, #tpu.memory_space<vmem>>) attributes {dimension_semantics = [#tpu.dimension_semantics<arbitrary>], iteration_bounds = array<i64: 1>, scalar_prefetch = 0 : i64, scratch_operands = 0 : i64, tpu.core_type = #tpu.core_type<tc>, window_params = [{transform_indices = @transform_0, window_bounds = array<i64: 1>}, {transform_indices = @transform_1, window_bounds = array<i64: 16, 128>}, {transform_indices = @transform_2, window_bounds = array<i64: 16, 128>}]} {
    %c0 = arith.constant 0 : index
    %0 = memref.load %arg1[%c0] : memref<1xi32, #tpu.memory_space<smem>>
    %1 = tpu.iota {dimensions = array<i32: 0>} : vector<8x128xi32>
    %2 = tpu.iota {dimensions = array<i32: 1>} : vector<8x128xi32>
    %c16_i32 = arith.constant 16 : i32
    %3 = arith.muli %arg0, %c16_i32 : i32
    %4 = vector.broadcast %3 : i32 to vector<8x128xi32>
    %5 = arith.addi %4, %1 : vector<8x128xi32>
    %c128_i32 = arith.constant 128 : i32
    %6 = vector.broadcast %c128_i32 : i32 to vector<8x128xi32>
    %7 = arith.muli %5, %6 : vector<8x128xi32>
    %8 = arith.addi %7, %2 : vector<8x128xi32>
    %c1024_i32 = arith.constant 1024 : i32
    %9 = vector.broadcast %c1024_i32 : i32 to vector<8x128xi32>
    %10 = arith.addi %8, %9 : vector<8x128xi32>
    %c-1640531535_i32 = arith.constant -1640531535 : i32
    %11 = arith.muli %0, %c-1640531535_i32 : i32
    %c-2048144777_i32 = arith.constant -2048144777 : i32
    %12 = arith.addi %11, %c-2048144777_i32 : i32
    %13 = vector.broadcast %12 : i32 to vector<8x128xi32>
    %14 = arith.xori %8, %13 : vector<8x128xi32>
    %c16_i32_0 = arith.constant 16 : i32
    %15 = vector.broadcast %c16_i32_0 : i32 to vector<8x128xi32>
    %16 = arith.shrui %14, %15 : vector<8x128xi32>
    %17 = arith.xori %14, %16 : vector<8x128xi32>
    %c2146121005_i32 = arith.constant 2146121005 : i32
    %18 = vector.broadcast %c2146121005_i32 : i32 to vector<8x128xi32>
    %19 = arith.muli %17, %18 : vector<8x128xi32>
    %c15_i32 = arith.constant 15 : i32
    %20 = vector.broadcast %c15_i32 : i32 to vector<8x128xi32>
    %21 = arith.shrui %19, %20 : vector<8x128xi32>
    %22 = arith.xori %19, %21 : vector<8x128xi32>
    %c-2073254261_i32 = arith.constant -2073254261 : i32
    %23 = vector.broadcast %c-2073254261_i32 : i32 to vector<8x128xi32>
    %24 = arith.muli %22, %23 : vector<8x128xi32>
    %c16_i32_1 = arith.constant 16 : i32
    %25 = vector.broadcast %c16_i32_1 : i32 to vector<8x128xi32>
    %26 = arith.shrui %24, %25 : vector<8x128xi32>
    %27 = arith.xori %24, %26 : vector<8x128xi32>
    %28 = vector.broadcast %12 : i32 to vector<8x128xi32>
    %29 = arith.xori %10, %28 : vector<8x128xi32>
    %c16_i32_2 = arith.constant 16 : i32
    %30 = vector.broadcast %c16_i32_2 : i32 to vector<8x128xi32>
    %31 = arith.shrui %29, %30 : vector<8x128xi32>
    %32 = arith.xori %29, %31 : vector<8x128xi32>
    %c2146121005_i32_3 = arith.constant 2146121005 : i32
    %33 = vector.broadcast %c2146121005_i32_3 : i32 to vector<8x128xi32>
    %34 = arith.muli %32, %33 : vector<8x128xi32>
    %c15_i32_4 = arith.constant 15 : i32
    %35 = vector.broadcast %c15_i32_4 : i32 to vector<8x128xi32>
    %36 = arith.shrui %34, %35 : vector<8x128xi32>
    %37 = arith.xori %34, %36 : vector<8x128xi32>
    %c-2073254261_i32_5 = arith.constant -2073254261 : i32
    %38 = vector.broadcast %c-2073254261_i32_5 : i32 to vector<8x128xi32>
    %39 = arith.muli %37, %38 : vector<8x128xi32>
    %c16_i32_6 = arith.constant 16 : i32
    %40 = vector.broadcast %c16_i32_6 : i32 to vector<8x128xi32>
    %41 = arith.shrui %39, %40 : vector<8x128xi32>
    %42 = arith.xori %39, %41 : vector<8x128xi32>
    %c9_i32 = arith.constant 9 : i32
    %43 = vector.broadcast %c9_i32 : i32 to vector<8x128xi32>
    %44 = arith.shrui %27, %43 : vector<8x128xi32>
    %c1065353216_i32 = arith.constant 1065353216 : i32
    %45 = vector.broadcast %c1065353216_i32 : i32 to vector<8x128xi32>
    %46 = arith.ori %44, %45 : vector<8x128xi32>
    %47 = tpu.bitcast %46 : vector<8x128xi32> -> vector<8x128xf32>
    %c9_i32_7 = arith.constant 9 : i32
    %48 = vector.broadcast %c9_i32_7 : i32 to vector<8x128xi32>
    %49 = arith.shrui %42, %48 : vector<8x128xi32>
    %c1065353216_i32_8 = arith.constant 1065353216 : i32
    %50 = vector.broadcast %c1065353216_i32_8 : i32 to vector<8x128xi32>
    %51 = arith.ori %49, %50 : vector<8x128xi32>
    %52 = tpu.bitcast %51 : vector<8x128xi32> -> vector<8x128xf32>
    %cst = arith.constant 2.000000e+00 : f32
    %53 = vector.broadcast %cst : f32 to vector<8x128xf32>
    %54 = arith.subf %53, %47 : vector<8x128xf32>
    %55 = math.log %54 : vector<8x128xf32>
    %cst_9 = arith.constant -2.000000e+00 : f32
    %56 = vector.broadcast %cst_9 : f32 to vector<8x128xf32>
    %57 = arith.mulf %56, %55 : vector<8x128xf32>
    %58 = math.sqrt %57 : vector<8x128xf32>
    %cst_10 = arith.constant 1.000000e+00 : f32
    %59 = vector.broadcast %cst_10 : f32 to vector<8x128xf32>
    %60 = arith.subf %52, %59 : vector<8x128xf32>
    %cst_11 = arith.constant 6.28318548 : f32
    %61 = vector.broadcast %cst_11 : f32 to vector<8x128xf32>
    %62 = arith.mulf %61, %60 : vector<8x128xf32>
    %63 = math.cos %62 : vector<8x128xf32>
    %64 = arith.mulf %58, %63 : vector<8x128xf32>
    %65 = math.sin %62 : vector<8x128xf32>
    %66 = arith.mulf %58, %65 : vector<8x128xf32>
    %c0_12 = arith.constant 0 : index
    %c0_13 = arith.constant 0 : index
    %67 = vector.load %arg2[%c0_12, %c0_13] : memref<16x128xf32, #tpu.memory_space<vmem>>, vector<8x128xf32>
    %cst_14 = arith.constant 5.000000e-02 : f32
    %68 = vector.broadcast %cst_14 : f32 to vector<8x128xf32>
    %69 = arith.mulf %64, %68 : vector<8x128xf32>
    %70 = arith.addf %67, %69 : vector<8x128xf32>
    %c0_15 = arith.constant 0 : index
    %c0_16 = arith.constant 0 : index
    %71 = vector.load %arg3[%c0_15, %c0_16] : memref<16x128xf32, #tpu.memory_space<vmem>>, vector<8x128xf32>
    tpu.vector_store %arg3[%c0_15, %c0_16], %70 {strides = array<i32>} : memref<16x128xf32, #tpu.memory_space<vmem>>, vector<8x128xf32>,
    %c8 = arith.constant 8 : index
    %c0_17 = arith.constant 0 : index
    %72 = vector.load %arg2[%c8, %c0_17] : memref<16x128xf32, #tpu.memory_space<vmem>>, vector<8x128xf32>
    %cst_18 = arith.constant 5.000000e-02 : f32
    %73 = vector.broadcast %cst_18 : f32 to vector<8x128xf32>
    %74 = arith.mulf %66, %73 : vector<8x128xf32>
    %75 = arith.addf %72, %74 : vector<8x128xf32>
    %c8_19 = arith.constant 8 : index
    %c0_20 = arith.constant 0 : index
    %76 = vector.load %arg3[%c8_19, %c0_20] : memref<16x128xf32, #tpu.memory_space<vmem>>, vector<8x128xf32>
    tpu.vector_store %arg3[%c8_19, %c0_20], %75 {strides = array<i32>} : memref<16x128xf32, #tpu.memory_space<vmem>>, vector<8x128xf32>,
    return
  }
  func.func @transform_0(%arg0: i32) -> i32 {
    %c0_i32 = arith.constant 0 : i32
    %c0_i32_0 = arith.constant 0 : i32
    return %c0_i32 : i32
  }
  func.func @transform_1(%arg0: i32) -> (i32, i32) {
    %c0_i32 = arith.constant 0 : i32
    %c0_i32_0 = arith.constant 0 : i32
    return %arg0, %c0_i32 : i32, i32
  }
  func.func @transform_2(%arg0: i32) -> (i32, i32) {
    %c0_i32 = arith.constant 0 : i32
    %c0_i32_0 = arith.constant 0 : i32
    return %arg0, %c0_i32 : i32, i32
  }
}

</mosaic_0001>

<bundles_post_ra>
// kernel: tpu_custom_call.1
= control target key start
LH: loop header
LB: loop body
LE: loop exit
PB: predicated region body
PF: predicated region fallthrough
CT: control target
= control target key end

     0   :  { %8 = vsyncpa [#allocation4], 0  ;;  %s593_s0 = inlined_call_operand.<no memory space> [shape: s32[1], index: 0, kind: input, shape index: {}]   ;;  %s594_s1 = inlined_call_operand.hbm [shape: f32[16,128], index: 1, kind: input, shape index: {}]   ;;  %s595_s2 = inlined_call_operand.hbm [shape: f32[16,128], index: 2, kind: output, shape index: {}]  }
   0x1   :  { %9 = vsyncpa [#allocation5], 0  ;;  %s16_s11 = sshll.u32 %s594_s1, 4  ;;  %s497_s12 = smov [#allocation3]   ;;  %s17_s11 = int_to_ptr.hbm [resolvable:$true] %s16_s11 }
   0x2   :  { %s18_s13 = sshll.u32 %s497_s12, 4  ;;  %s498_s14 = smov 128   ;;  %s19_s13 = int_to_ptr.vmem [resolvable:$true] %s18_s13 }
   0x3   :  { %s499_s15 = smov 8  }
   0x4   :  { %24 = dma.hbm_to_vmem [thread:$0]  %s17_s11, 256, %s19_s13, [#allocation4], %s498_s14, %s498_s14, %s499_s15  }
   0x5   :  { %493 = dma.done.wait [#allocation4], 256  }
   0x6   :  { %494 = vsyncadd [#allocation4], 4294967040  ;;  %v30_v0 = vlaneseq  ;;  %s40_s18 = smul.u32 2654435761, %s593_s0  ;;  %v500_v37 = vmov 683565275  }
   0x7   :  { %v501_v39 = vmov 2475754826   ;;  %v502_v41 = vmov 2131351028   ;;  %v503_v43 = vmov 2102212464  }
   0x8   :  { %v31_v1 = vshrl.u32 %v30_v0, 7  ;;  %v33_v2 = vand.u32 127, %v30_v0  ;;  %s41_s1 = sadd.s32 2246822519, %s40_s18  ;;  %v504_v45 = vmov 920167782  }
   0x9   :  { %v42_v5 = vstv %s41_s1  ;;  %v505_v52 = vmov 1326507024   ;;  %s507_s0 = smov [#allocation6]   ;;  %s410_s22 = sshll.u32 %s595_s2, 4  ;;  %s411_s22 = int_to_ptr.hbm [resolvable:$true] %s410_s22 }
   0xa   :  { %v37_v3 = vmul.u32 128, %v31_v1  ;;  %s408_s19 = sshll.u32 %s507_s0, 4  ;;  %s409_s19 = int_to_ptr.vmem [resolvable:$true] %s408_s19 }
   0xc   :  { %v38_v4 = vadd.s32 %v37_v3, %v33_v2 }
   0xe   :  { %v39_v6 = vadd.s32 1024, %v38_v4  ;;  %v43_v7 = vxor.u32 %v42_v5, %v38_v4 }
  0x10   :  { %v52_v8 = vxor.u32 %v42_v5, %v39_v6  ;;  %v44_v18 = vshrl.u32 %v43_v7, 16 }
  0x12   :  { %v53_v9 = vshrl.u32 %v52_v8, 16  ;;  %v45_v21 = vxor.u32 %v44_v18, %v43_v7 }
  0x14   :  { %v54_v10 = vxor.u32 %v53_v9, %v52_v8  ;;  %v46_v24 = vmul.u32 2146121005, %v45_v21 }
  0x16   :  { %v55_v11 = vmul.u32 2146121005, %v54_v10  ;;  %v47_v28 = vshrl.u32 %v46_v24, 15 }
  0x18   :  { %v56_v12 = vshrl.u32 %v55_v11, 15  ;;  %v48_v32 = vxor.u32 %v47_v28, %v46_v24 }
  0x1a   :  { %v57_v13 = vxor.u32 %v56_v12, %v55_v11  ;;  %v49_v47 = vmul.u32 2221713035, %v48_v32 }
  0x1c   :  { %v58_v14 = vmul.u32 2221713035, %v57_v13  ;;  %v50_v61 = vshrl.u32 %v49_v47, 16 }
  0x1e   :  { %v59_v15 = vshrl.u32 %v58_v14, 16  ;;  %v51_v10 = vxor.u32 %v50_v61, %v49_v47 }
  0x20   :  { %v60_v16 = vxor.u32 %v59_v15, %v58_v14 }
  0x22   :  { %v64_v17 = vshrl.u32 %v60_v16, 9 }
  0x24   :  { %v65_v19 = vor.u32 1065353216, %v64_v17 }
  0x26   :  { %v423_v20 = vadd.f32 -1.0, %v65_v19 }
  0x28   :  { %v532_v22 = vmul.f32 6.2831855, %v423_v20 }
  0x2a   :  { %v88_v23 = vand.u32 2139095040, %v532_v22  ;;  %v85_v26 = vand.u32 2147483647, %v532_v22  ;;  %vm87_vm12 = vcmp.lt.s32.totalorder %v532_v22, 0 }
  0x2c   :  { %v89_v25 = vshrl.u32 %v88_v23, 23  ;;  %v92_v30 = vand.u32 8388607, %v85_v26  ;;  %v61_v23 = vshrl.u32 %v51_v10, 9  ;;  %vm86_vm13 = vcmp.le.f32.partialorder %v85_v26, 0.7853982 }
  0x2e   :  { %v424_v27 = vadd.s32 4294967169, %v89_v25  ;;  %v93_v35 = vor.u32 8388608, %v92_v30  ;;  %v62_v47 = vor.u32 1065353216, %v61_v23 }
  0x30   :  { %v95_v29 = vadd.s32 1, %v424_v27  ;;  %v542_v56 = vshll.u32 %v93_v35, 8 }
  0x32   :  { %vm96_vm0 = vcmp.gt.s32.totalorder %v95_v29, 0  ;;  %v134_v3 = vand.u32 65535, %v542_v56  ;;  %v135_v4 = vshrl.u32 %v542_v56, 16 }
  0x33   :  { %v97_v31 = vsel %vm96_vm0, %v95_v29, 0 }
  0x34   :  { %v99_v33 = vand.u32 31, %v97_v31  ;;  %v538_v34 = vshrl.u32 %v97_v31, 5  ;;  %v506_v31 = vmov 0  }
  0x36   :  { %v100_v36 = vsub.s32 32, %v99_v33  ;;  %v102_v38 = vshll.u32 %v500_v37, %v99_v33  ;;  %v105_v40 = vshll.u32 %v501_v39, %v99_v33  ;;  %v108_v42 = vshll.u32 %v502_v41, %v99_v33 }
  0x37   :  { %v111_v44 = vshll.u32 %v503_v43, %v99_v33  ;;  %v114_v46 = vshll.u32 %v504_v45, %v99_v33  ;;  %vm117_vm1 = vcmp.lt.s32.totalorder %v538_v34, 1  ;;  %vm120_vm2 = vcmp.lt.s32.totalorder %v538_v34, 4 }
  0x38   :  { %v103_v48 = vshrl.u32 %v501_v39, %v100_v36  ;;  %v106_v49 = vshrl.u32 %v502_v41, %v100_v36  ;;  %v109_v50 = vshrl.u32 %v503_v43, %v100_v36  ;;  %v112_v51 = vshrl.u32 %v504_v45, %v100_v36 }
  0x39   :  { %v115_v53 = vshrl.u32 %v505_v52, %v100_v36  ;;  %vm119_vm3 = vcmp.lt.s32.totalorder %v538_v34, 3  ;;  %vm118_vm4 = vcmp.lt.s32.totalorder %v538_v34, 2  ;;  %v101_v12 = vshrl.u32 %v500_v37, %v100_v36 }
  0x3a   :  { %v104_v54 = vor.u32 %v103_v48, %v102_v38  ;;  %v107_v55 = vor.u32 %v106_v49, %v105_v40  ;;  %v110_v57 = vor.u32 %v109_v50, %v108_v42  ;;  %v113_v58 = vor.u32 %v112_v51, %v111_v44 }
  0x3b   :  { %v116_v59 = vor.u32 %v115_v53, %v114_v46 }
  0x3c   :  { %v125_v60 = vsel %vm117_vm1, %v104_v54, %v107_v55  ;;  %v126_v62 = vsel %vm120_vm2, %v113_v58, 920167782  ;;  %v129_v63 = vsel %vm117_vm1, %v107_v55, %v110_v57  ;;  %v121_v27 = vsel %vm117_vm1, %v101_v12, %v104_v54 }
  0x3d   :  { %v130_v0 = vsel %vm120_vm2, %v116_v59, 1326507024  ;;  %v127_v1 = vsel %vm119_vm3, %v110_v57, %v126_v62  ;;  %v122_v30 = vsel %vm120_vm2, %v110_v57, 2102212464  ;;  %v67_v54 = vsub.f32 2.0, %v62_v47 }
  0x3e   :  { %v131_v2 = vsel %vm119_vm3, %v113_v58, %v130_v0  ;;  %v128_v5 = vsel %vm118_vm4, %v125_v60, %v127_v1  ;;  %v123_v41 = vsel %vm119_vm3, %v107_v55, %v122_v30 }
  0x3f   :  { %v132_v6 = vsel %vm118_vm4, %v129_v63, %v131_v2  ;;  %v158_v9 = vand.u32 65535, %v128_v5  ;;  %v159_v11 = vshrl.u32 %v128_v5, 16  ;;  %v124_v50 = vsel %vm118_vm4, %v121_v27, %v123_v41 }
  0x40   :  { %v136_v7 = vand.u32 65535, %v132_v6  ;;  %v137_v8 = vshrl.u32 %v132_v6, 16  ;;  %v178_v57 = vmul.u32 %v542_v56, %v124_v50  ;;  %441 = vlog2.f32 %v67_v54 }
  0x41   :  { %v160_v16 = vmul.u32 %v158_v9, %v134_v3  ;;  %v161_v17 = vmul.u32 %v159_v11, %v134_v3  ;;  %v162_v18 = vmul.u32 %v158_v9, %v135_v4  ;;  %v163_v24 = vmul.u32 %v159_v11, %v135_v4 }
  0x42   :  { %v138_v13 = vmul.u32 %v136_v7, %v134_v3  ;;  %v139_v14 = vmul.u32 %v137_v8, %v134_v3  ;;  %v140_v15 = vmul.u32 %v136_v7, %v135_v4  ;;  %v141_v19 = vmul.u32 %v137_v8, %v135_v4 }
  0x43   :  { %v164_v25 = vshll.u32 %v161_v17, 16  ;;  %v166_v29 = vshll.u32 %v162_v18, 16  ;;  %v165_v39 = vshrl.u32 %v161_v17, 16  ;;  %v167_v45 = vshrl.u32 %v162_v18, 16 }
  0x44   :  { %v142_v20 = vshll.u32 %v139_v14, 16  ;;  %v144_v21 = vshll.u32 %v140_v15, 16  ;;  %v143_v35 = vshrl.u32 %v139_v14, 16  ;;  %v145_v42 = vshrl.u32 %v140_v15, 16 }
  0x45   :  { %vm168_vm6 = vc.u32 %v160_v16, %v164_v25  ;;  %v170_v33 = vadd.s32 %v164_v25, %v160_v16 }
  0x46   :  { %vm146_vm5 = vc.u32 %v138_v13, %v142_v20  ;;  %v148_v28 = vadd.s32 %v142_v20, %v138_v13  ;;  %v169_v37 = vsel %vm168_vm6, 1, %v506_v31  ;;  %v442_v62 = vpop.eup %441  ;;  %vm228_vm6 = vweird.f32 %v532_v22 }
  0x47   :  { %v147_v32 = vsel %vm146_vm5, 1, %v506_v31  ;;  %v171_v40 = vadd.s32 %v169_v37, %v163_v24  ;;  %vm172_vm8 = vc.u32 %v170_v33, %v166_v29  ;;  %v174_v49 = vadd.s32 %v170_v33, %v166_v29 }
  0x48   :  { %v149_v36 = vadd.s32 %v147_v32, %v141_v19  ;;  %vm150_vm7 = vc.u32 %v148_v28, %v144_v21  ;;  %v173_v44 = vsel %vm172_vm8, 1, %v506_v31  ;;  %v69_v1 = vmul.f32 0.6931472, %v442_v62 }
  0x49   :  { %v151_v38 = vsel %vm150_vm7, 1, %v506_v31  ;;  %v175_v46 = vadd.s32 %v173_v44, %v171_v40 }
  0x4a   :  { %v153_v43 = vadd.s32 %v151_v38, %v149_v36  ;;  %v573_v3 = vmul.f32 -2.0, %v69_v1 }
  0x4b   :  { %v176_v51 = vadd.s32 %v175_v46, %v165_v39 }
  0x4c   :  { %v154_v48 = vadd.s32 %v153_v43, %v143_v35  ;;  %443 = vrsqrt.f32 %v573_v3  ;;  %vm78_vm14 = vcmp.eq.f32.partialorder %v573_v3, inf  ;;  %vm80_vm1 = vcmp.eq.f32.partialorder %v573_v3, 0.0 }
  0x4d   :  { %v177_v53 = vadd.s32 %v176_v51, %v167_v45 }
  0x4e   :  { %v155_v52 = vadd.s32 %v154_v48, %v145_v42 }
  0x4f   :  { %v181_v58 = vadd.s32 1, %v177_v53 }
  0x50   :  { %vm180_vm9 = vc.u32 %v155_v52, %v174_v49  ;;  %v179_v56 = vadd.s32 %v174_v49, %v155_v52  ;;  %v81_v49 = vand.u32 2147483648, %v573_v3 }
  0x51   :  { %v182_v55 = vsel %vm180_vm9, %v181_v58, %v177_v53 }
  0x52   :  { %v183_v59 = vadd.s32 %v182_v55, %v178_v57  ;;  %v444_v12 = vpop.eup %443 }
  0x53   :  { %v72_v17 = vmul.f32 %v444_v12, %v573_v3 }
  0x54   :  { %v184_v60 = vadd.s32 536870912, %v183_v59 }
  0x55   :  { %v73_v20 = vmul.f32 %v444_v12, %v72_v17 }
  0x56   :  { %v185_v61 = vshrl.u32 %v184_v60, 30 }
  0x57   :  { %v74_v25 = vmul.f32 0.5, %v73_v20 }
  0x58   :  { %v186_v63 = vshll.u32 %v185_v61, 30  ;;  %v209_v21 = vsub.s32 4, %v185_v61 }
  0x59   :  { %v75_v33 = vsub.f32 1.5, %v74_v25 }
  0x5a   :  { %v187_v0 = vsub.s32 %v183_v59, %v186_v63  ;;  %v210_v27 = vsel %vm87_vm12, %v209_v21, %v185_v61 }
  0x5b   :  { %v212_v30 = vsel %vm86_vm13, 0, %v210_v27  ;;  %v76_v40 = vmul.f32 %v444_v12, %v75_v33 }
  0x5c   :  { %vm188_vm10 = vcmp.lt.s32.totalorder %v187_v0, 0  ;;  %v189_v34 = vsub.s32 0, %v187_v0  ;;  %v384_v37 = vadd.s32 3, %v212_v30  ;;  %v229_v26 = vand.u32 3, %v212_v30 }
  0x5d   :  { %v77_v46 = vmul.f32 %v76_v40, %v573_v3 }
  0x5e   :  { %v190_v2 = vsel %vm188_vm10, %v189_v34, %v187_v0  ;;  %v385_v43 = vand.u32 3, %v384_v37  ;;  %vm234_vm15 = vcmp.eq.s32.totalorder %v229_v26, 2  ;;  %vm230_vm2 = vcmp.lt.s32.totalorder %v229_v26, 2  ;;  %v396_v34 = vld [vmem:[#allocation3] sm:$0xff] }
  0x5f   :  { %v191_v4 = vclz %v190_v2  ;;  %v79_v52 = vsel %vm78_vm14, %v573_v3, %v77_v46  ;;  %vm231_vm3 = vcmp.eq.s32.totalorder %v229_v26, 0  ;;  %v400_v2 = vld [vmem:[#allocation3 + $0x8] sm:$0xff] }
  0x60   :  { %vm390_vm0 = vcmp.eq.s32.totalorder %v385_v43, 2  ;;  %vm387_vm4 = vcmp.eq.s32.totalorder %v385_v43, 0  ;;  %vm386_vm5 = vcmp.lt.s32.totalorder %v385_v43, 2  ;;  %v82_v58 = vsel %vm80_vm1, %v81_v49, %v79_v52 }
  0x61   :  { %v425_v5 = vadd.s32 4294967294, %v191_v4 }
  0x63   :  { %vm426_vm11 = vcmp.lt.s32.totalorder %v425_v5, 0 }
  0x64   :  { %v194_v6 = vsel %vm426_vm11, 0, %v425_v5 }
  0x65   :  { %v195_v7 = vsub.s32 32, %v194_v6  ;;  %v196_v8 = vshll.u32 %v187_v0, %v194_v6  ;;  %v199_v9 = vsub.s32 4294967266, %v194_v6 }
  0x67   :  { %v197_v10 = vshrl.u32 %v179_v56, %v195_v7  ;;  %v200_v11 = vadd.s32 127, %v199_v9 }
  0x69   :  { %v198_v13 = vor.u32 %v197_v10, %v196_v8  ;;  %v201_v14 = vshll.u32 %v200_v11, 23 }
  0x6b   :  { %v202_v15 = vor.u32 4788187, %v201_v14  ;;  %v205_v16 = vcvt.s32.f32 %v198_v13 }
  0x6d   :  { %v203_v18 = vand.u32 2147483647, %v202_v15 }
  0x6f   :  { %v206_v19 = vmul.f32 %v205_v16, %v203_v18 }
  0x71   :  { %v207_v23 = vxor.u32 2147483648, %v206_v19 }
  0x73   :  { %v208_v24 = vsel %vm87_vm12, %v207_v23, %v206_v19 }
  0x74   :  { %v211_v28 = vsel %vm86_vm13, %v532_v22, %v208_v24 }
  0x75   :  { %v213_v29 = vmul.f32 %v211_v28, %v211_v28 }
  0x77   :  { %v214_v31 = vmul.f32 -0.001358992, %v213_v29  ;;  %v221_v32 = vmul.f32 -0.00019511016, %v213_v29 }
  0x79   :  { %v215_v35 = vadd.f32 0.041655596, %v214_v31  ;;  %v222_v36 = vadd.f32 0.008332121, %v221_v32 }
  0x7b   :  { %v216_v38 = vmul.f32 %v215_v35, %v213_v29  ;;  %v223_v39 = vmul.f32 %v222_v36, %v213_v29 }
  0x7d   :  { %v217_v41 = vadd.f32 -0.4999988, %v216_v38  ;;  %v224_v42 = vadd.f32 -0.16666654, %v223_v39 }
  0x7f   :  { %v218_v44 = vmul.f32 %v217_v41, %v213_v29  ;;  %v225_v45 = vmul.f32 %v224_v42, %v213_v29 }
  0x81   :  { %v219_v47 = vadd.f32 1.0, %v218_v44  ;;  %v226_v48 = vadd.f32 1.0, %v225_v45 }
  0x83   :  { %v227_v50 = vmul.f32 %v226_v48, %v211_v28  ;;  %v235_v51 = vxor.u32 2147483648, %v219_v47 }
  0x85   :  { %v232_v53 = vxor.u32 2147483648, %v227_v50  ;;  %v236_v54 = vsel %vm234_vm15, %v235_v51, %v227_v50  ;;  %v392_v57 = vsel %vm390_vm0, %v235_v51, %v227_v50 }
  0x87   :  { %v233_v55 = vsel %vm231_vm3, %v219_v47, %v232_v53  ;;  %v389_v59 = vsel %vm387_vm4, %v219_v47, %v232_v53 }
  0x88   :  { %v237_v60 = vsel %vm230_vm2, %v233_v55, %v236_v54  ;;  %v393_v61 = vsel %vm386_vm5, %v389_v59, %v392_v57 }
  0x89   :  { %v238_v62 = vsel %vm228_vm6, nan, %v237_v60  ;;  %v394_v63 = vsel %vm228_vm6, nan, %v393_v61 }
  0x8a   :  { %v239_v0 = vmul.f32 %v238_v62, %v82_v58  ;;  %v395_v1 = vmul.f32 %v394_v63, %v82_v58 }
  0x8c   :  { %v397_v3 = vmul.f32 0.05, %v239_v0  ;;  %v401_v4 = vmul.f32 0.05, %v395_v1 }
  0x8e   :  { %v398_v22 = vadd.f32 %v397_v3, %v396_v34  ;;  %v402_v5 = vadd.f32 %v401_v4, %v400_v2 }
  0x90   :  { %399 = vst [vmem:[#allocation6] sm:$0xff] %v398_v22 }
  0x91   :  { %403 = vst [vmem:[#allocation6 + $0x8] sm:$0xff] %v402_v5 }
  0x92   :  { %416 = dma.vmem_to_hbm [thread:$0]  %s409_s19, 256, %s411_s22, [#allocation5], %s498_s14, %s498_s14, %s499_s15  }
  0x93   :  { %495 = dma.done.wait [#allocation5], 256  }
  0x94   :  { %496 = vsyncadd [#allocation5], 4294967040 }
  0x95   :  { %421 = vsyncpa [#allocation4], 1 }
  0x96   :  { %422 = vsyncpa [#allocation5], 1 }

</bundles_post_ra>
